<compile_context>
chip_gen: v7x
topology: tpu7x:2x2x1
jax: 0.10.0
libtpu: 0.0.40
codegen_flags: <defaults>
</compile_context>

<pallas_src>
import math
import itertools

import jax
import jax.numpy as jnp
from jax.experimental import pallas as pl
from jax.experimental.pallas import tpu as pltpu

# ----------------------------- configuration ---------------------------------
N_POINTS = 512

N_OUTPUT_DIM = 16
NUM_LEVELS = 4
FEATURES_PER_LEVEL = 2
PER_LEVEL_SCALE = (1.5, 1.5, 1.5, 1.3)
BASE_RES = (8, 8, 8, 8)                 # level_one_bins = BASE_RES[-1]
LEVEL_ONE_BINS = BASE_RES[-1]
LOG2_HASH_SPATIAL = 10
LOG2_HASH_TEMPORAL = 10
HIDDEN_DIM = 32
NUM_LAYERS = 2                          # -> n_hidden_layers = 1
MASK_RESO = (8, 8, 8)
MASK_LOG2_HASH = 10

ENC_DIM = NUM_LEVELS * FEATURES_PER_LEVEL        # 8
PROD_IN = 2                                      # prod_enc output dim (1 level x 2 feats)
PROD_OUT = 1 + LEVEL_ONE_BINS                    # 9
PROD_HIDDEN = 16                                 # temporal_prod_net n_neurons=16

# fused block-diagonal MLP dims (padded to sublane/lane friendly sizes)
FUSED_IN = 3 * ENC_DIM + PROD_IN                 # 26
IN_ROWS = 32                                     # padded input-feature rows
FUSED_HID = 3 * HIDDEN_DIM + PROD_HIDDEN         # 112
HID_ROWS = 128                                   # padded hidden rows
FUSED_OUT = 3 * N_OUTPUT_DIM + PROD_OUT          # 57
Y_ROWS = 64                                      # padded fused-output rows
PROD_PAD = 16                                    # padded prod-output rows (sigmoid block)
OUT_ROWS = 40                                    # [out(16) | spatial(16) | mask(8)]

_PRIMES = (1, 2654435761, 805459861, 3674653429)


# ------------------------- hash-grid encoder (plain JAX glue) -----------------
def make_grid_encoder(key, input_dim, num_levels, level_dim, per_level_scale,
                      base_resolution, log2_hashmap_size, std=1e-4):
    if not isinstance(per_level_scale, (tuple, list)):
        per_level_scale = (per_level_scale,) * input_dim
    if not isinstance(base_resolution, (tuple, list)):
        base_resolution = (base_resolution,) * input_dim
    hashmap_size = 2 ** log2_hashmap_size
    resolutions = []
    for lvl in range(num_levels):
        resolutions.append(tuple(
            int(math.ceil(base_resolution[d] * (per_level_scale[d] ** lvl)))
            for d in range(input_dim)))
    emb = std * jax.random.normal(
        key, (num_levels, hashmap_size, level_dim), dtype=jnp.float32)
    return dict(embeddings=emb, resolutions=tuple(resolutions),
                hashmap_size=hashmap_size, input_dim=input_dim,
                level_dim=level_dim)


def grid_encode(params, x):
    """Multires hash encoding with multilinear interpolation.  x: (N, D) in [0,1)."""
    d_in = params["input_dim"]
    emb = params["embeddings"]
    hm = params["hashmap_size"]
    primes = jnp.asarray(_PRIMES[:d_in], dtype=jnp.uint32)
    outs = []
    for lvl, res in enumerate(params["resolutions"]):
        res_f = jnp.asarray(res, dtype=jnp.float32)
        pos = jnp.clip(x.astype(jnp.float32) * (res_f - 1.0), 0.0, res_f - 1.0)
        pos0 = jnp.floor(pos)
        frac = pos - pos0
        pos0u = pos0.astype(jnp.uint32)
        feat = jnp.zeros((x.shape[0], params["level_dim"]), jnp.float32)
        for corner in itertools.product((0, 1), repeat=d_in):
            c_u = jnp.asarray(corner, dtype=jnp.uint32)
            c_b = jnp.asarray(corner, dtype=bool)
            coord = pos0u + c_u
            w = jnp.prod(jnp.where(c_b, frac, 1.0 - frac), axis=-1, keepdims=True)
            h = coord * primes
            idx = h[..., 0]
            for d in range(1, d_in):
                idx = idx ^ h[..., d]
            idx = (idx & jnp.uint32(hm - 1)).astype(jnp.int32)
            feat = feat + w * emb[lvl][idx]
        outs.append(feat)
    return jnp.concatenate(outs, axis=-1)


# ------------------------------- Pallas kernel --------------------------------
def st_hier_kernel(enc_ref, oneh_ref, w0t_ref, w1t_ref, out_ref):
    # Feature-major: features on sublanes, points on lanes.
    x = enc_ref[...]                                                    # (32, TN) bf16

    # One block-diagonal matmul pair covers all four MLPs (ReLU hidden, linear out).
    h = jnp.maximum(
        jnp.dot(w0t_ref[...], x, preferred_element_type=jnp.float32), 0.0)    # (128, TN)
    y = jnp.dot(w1t_ref[...], h.astype(jnp.bfloat16),
                preferred_element_type=jnp.float32)                           # (64, TN)

    # All slices are 8-sublane aligned (16-row groups).
    s = y[0:N_OUTPUT_DIM, :]                                            # spatial_component
    l1 = y[N_OUTPUT_DIM:2 * N_OUTPUT_DIM, :]                            # level_one_component
    t = y[2 * N_OUTPUT_DIM:3 * N_OUTPUT_DIM, :]                         # temporal_component
    p = jax.nn.sigmoid(y[3 * N_OUTPUT_DIM:3 * N_OUTPUT_DIM + PROD_PAD, :])   # (16, TN)

    m0 = p[0:1, :]                                                      # level-zero mask
    # level-one gather: precomputed one-hot -> lane-dense multiply + sublane reduce.
    m1 = jnp.sum(p * oneh_ref[...], axis=0, keepdims=True)              # (1, TN)

    # mode == 'mst' hierarchical blending (f32).
    out = s * m0 + (1.0 - m0) * (l1 * m1 + t * (1.0 - m1))

    # Single full-tile, lane-dense store: [out | spatial | mask-broadcast].
    n_lanes = out.shape[1]
    out_ref[...] = jnp.concatenate(
        [out, s, jnp.broadcast_to(m1, (OUT_ROWS - 2 * N_OUTPUT_DIM, n_lanes))], axis=0)


# ------------------------------ wrapper ---------------------------------------
def pack_weights(w):
    """Block-diagonal, zero-padded, transposed (feature-major) bf16 weight pair."""
    w0 = jnp.zeros((IN_ROWS, HID_ROWS), jnp.float32)
    w0 = w0.at[0:ENC_DIM, 0:HIDDEN_DIM].set(w["ws0"])
    w0 = w0.at[ENC_DIM:2 * ENC_DIM, HIDDEN_DIM:2 * HIDDEN_DIM].set(w["wl0"])
    w0 = w0.at[2 * ENC_DIM:3 * ENC_DIM, 2 * HIDDEN_DIM:3 * HIDDEN_DIM].set(w["wt0"])
    w0 = w0.at[3 * ENC_DIM:3 * ENC_DIM + PROD_IN,
               3 * HIDDEN_DIM:3 * HIDDEN_DIM + PROD_HIDDEN].set(w["wp0"])

    w1 = jnp.zeros((HID_ROWS, Y_ROWS), jnp.float32)
    w1 = w1.at[0:HIDDEN_DIM, 0:N_OUTPUT_DIM].set(w["ws1"])
    w1 = w1.at[HIDDEN_DIM:2 * HIDDEN_DIM, N_OUTPUT_DIM:2 * N_OUTPUT_DIM].set(w["wl1"])
    w1 = w1.at[2 * HIDDEN_DIM:3 * HIDDEN_DIM,
               2 * N_OUTPUT_DIM:3 * N_OUTPUT_DIM].set(w["wt1"])
    w1 = w1.at[3 * HIDDEN_DIM:3 * HIDDEN_DIM + PROD_HIDDEN,
               3 * N_OUTPUT_DIM:3 * N_OUTPUT_DIM + PROD_OUT].set(w["wp1"])
    # Transpose for feature-major compute (y = W^T @ x); bf16 operands for the MXU.
    return w0.T.astype(jnp.bfloat16), w1.T.astype(jnp.bfloat16)


def _points_per_tile(n):
    """v7x has 2 TensorCores/chip -> 2-wide 'parallel' grid; v5e/v6e are single-TC,
    so one full block minimizes per-step overhead."""
    multi_tc = False
    try:
        kind = jax.devices()[0].device_kind.lower()
        multi_tc = "7" in kind            # e.g. "TPU7x"
    except Exception:
        pass
    if multi_tc and n >= 256 and (n // 2) % 128 == 0:
        return n // 2
    return n


def st_module_forward(x, params):
    n = x.shape[0]
    assert n % 128 == 0, "point count must be lane-aligned (multiple of 128)"

    # ---- hash-grid encodings (plain JAX, fused by the surrounding jit) ----
    enc = jnp.concatenate([
        grid_encode(params["spatial_enc"], x[..., :3]),
        grid_encode(params["l1_enc"], x),
        grid_encode(params["temporal_enc"], x),
        grid_encode(params["prod_enc"], x[..., :3]),
    ], axis=-1)                                                      # (n, 26) f32

    # Feature-major bf16 slab, zero-padded to 32 sublane rows.
    enc_fm = jnp.pad(enc.T, ((0, IN_ROWS - FUSED_IN), (0, 0))).astype(jnp.bfloat16)

    # level_one index in full f32 precision on the wrapper side; delivered as a one-hot
    # so the in-kernel gather is a lane-dense multiply + sublane reduce.  Clamp matches
    # take_along_axis clipping; the PyTorch module assumes t in [0, 1) so idx is in-range.
    idx = jnp.clip((x[:, 3] * LEVEL_ONE_BINS).astype(jnp.int32) + 1, 0, LEVEL_ONE_BINS)
    onehot = (jnp.arange(PROD_PAD, dtype=jnp.int32)[:, None] == idx[None, :]
              ).astype(jnp.float32)                                  # (16, n)

    w0t, w1t = pack_weights(params["weights"])                       # (128,32), (64,128) bf16

    tile_n = _points_per_tile(n)
    grid = (n // tile_n,)

    cost = pl.CostEstimate(
        flops=2 * n * (IN_ROWS * HID_ROWS + HID_ROWS * Y_ROWS),
        transcendentals=n * PROD_PAD,
        bytes_accessed=(IN_ROWS * n * 2 + PROD_PAD * n * 4
                        + (HID_ROWS * IN_ROWS + Y_ROWS * HID_ROWS) * 2
                        + OUT_ROWS * n * 4),
    )

    packed = pl.pallas_call(
        st_hier_kernel,
        out_shape=jax.ShapeDtypeStruct((OUT_ROWS, n), jnp.float32),
        grid=grid,
        in_specs=[
            pl.BlockSpec((IN_ROWS, tile_n), lambda i: (0, i)),       # encoding slab (bf16)
            pl.BlockSpec((PROD_PAD, tile_n), lambda i: (0, i)),      # one-hot (f32)
            pl.BlockSpec((HID_ROWS, IN_ROWS), lambda i: (0, 0)),     # W0^T (bf16, resident)
            pl.BlockSpec((Y_ROWS, HID_ROWS), lambda i: (0, 0)),      # W1^T (bf16, resident)
        ],
        out_specs=pl.BlockSpec((OUT_ROWS, tile_n), lambda i: (0, i)),
        compiler_params=pltpu.CompilerParams(dimension_semantics=("parallel",)),
        cost_estimate=cost,
    )(enc_fm, onehot, w0t, w1t)

    out = packed[0:N_OUTPUT_DIM, :].T
    spatial = packed[N_OUTPUT_DIM:2 * N_OUTPUT_DIM, :].T
    mask = packed[2 * N_OUTPUT_DIM, :]
    return out, spatial, mask


# --------------------------- reference (plain JAX) -----------------------------
def reference_forward(x, params):
    w = params["weights"]

    def mlp(e, w0, w1):
        h = jnp.maximum(jnp.dot(e, w0), 0.0)
        return jnp.dot(h, w1)

    s = mlp(grid_encode(params["spatial_enc"], x[..., :3]), w["ws0"], w["ws1"])
    l1 = mlp(grid_encode(params["l1_enc"], x), w["wl0"], w["wl1"])
    t = mlp(grid_encode(params["temporal_enc"], x), w["wt0"], w["wt1"])
    p = jax.nn.sigmoid(
        mlp(grid_encode(params["prod_enc"], x[..., :3]), w["wp0"], w["wp1"]))
    idx = jnp.clip((x[:, 3] * LEVEL_ONE_BINS).astype(jnp.int32) + 1, 0, LEVEL_ONE_BINS)
    m1 = jnp.take_along_axis(p, idx[:, None], axis=1)
    m0 = p[:, 0:1]
    out = s * m0 + (1.0 - m0) * (l1 * m1 + t * (1.0 - m1))
    return out, s, m1[:, 0]


# ------------------------------ parameter init ---------------------------------
def build_params(key):
    ks = jax.random.split(key, 12)
    spatial_enc = make_grid_encoder(ks[0], 3, NUM_LEVELS, FEATURES_PER_LEVEL,
                                    PER_LEVEL_SCALE[:3], BASE_RES[:3],
                                    LOG2_HASH_SPATIAL)
    l1_enc = make_grid_encoder(ks[1], 4, NUM_LEVELS, FEATURES_PER_LEVEL,
                               PER_LEVEL_SCALE[:3] + (1,), BASE_RES,
                               LOG2_HASH_SPATIAL)
    temporal_enc = make_grid_encoder(ks[2], 4, NUM_LEVELS, FEATURES_PER_LEVEL,
                                     PER_LEVEL_SCALE, BASE_RES,
                                     LOG2_HASH_TEMPORAL)
    prod_enc = make_grid_encoder(ks[3], 3, 1, 2, 1, MASK_RESO, MASK_LOG2_HASH)

    def dense(k, fan_in, fan_out):
        return (jax.random.normal(k, (fan_in, fan_out), dtype=jnp.float32)
                / math.sqrt(fan_in))

    weights = dict(
        ws0=dense(ks[4], ENC_DIM, HIDDEN_DIM),
        ws1=dense(ks[5], HIDDEN_DIM, N_OUTPUT_DIM),
        wl0=dense(ks[6], ENC_DIM, HIDDEN_DIM),
        wl1=dense(ks[7], HIDDEN_DIM, N_OUTPUT_DIM),
        wt0=dense(ks[8], ENC_DIM, HIDDEN_DIM),
        wt1=dense(ks[9], HIDDEN_DIM, N_OUTPUT_DIM),
        wp0=dense(ks[10], PROD_IN, PROD_HIDDEN),
        wp1=dense(ks[11], PROD_HIDDEN, PROD_OUT),
    )
    return dict(spatial_enc=spatial_enc, l1_enc=l1_enc,
                temporal_enc=temporal_enc, prod_enc=prod_enc, weights=weights)


# ----------------------------------- main ---------------------------------------
if __name__ == "__main__":
    root = jax.random.PRNGKey(0)
    k_params, k_x = jax.random.split(root)
    params = build_params(k_params)

    # x: (N, 4) = (xyz, t), all in [0, 1)
    x = jax.random.uniform(k_x, (N_POINTS, 4), dtype=jnp.float32,
                           minval=0.0, maxval=0.999)

    # One jit over encode + kernel: the encode's many small ops fuse into one XLA program.
    fwd = jax.jit(lambda xx: st_module_forward(xx, params))
    out, spatial, mask = fwd(x)
    jax.block_until_ready((out, spatial, mask))

    ref_out, ref_spatial, ref_mask = reference_forward(x, params)
    # bf16 MXU operands in the kernel vs f32 reference -> relaxed tolerances
    # (output scale ~1e-4 from std=1e-4 hash tables; expected abs error << 1e-5).
    assert jnp.allclose(out, ref_out, atol=2e-5, rtol=2e-2), \
        f"output mismatch, max abs diff {jnp.max(jnp.abs(out - ref_out))}"
    assert jnp.allclose(spatial, ref_spatial, atol=2e-5, rtol=2e-2), \
        f"spatial mismatch, max abs diff {jnp.max(jnp.abs(spatial - ref_spatial))}"
    assert jnp.allclose(mask, ref_mask, atol=2e-5, rtol=2e-2), \
        f"mask mismatch, max abs diff {jnp.max(jnp.abs(mask - ref_mask))}"

    print("KERNEL_OK")
</pallas_src>

<mosaic_0001>
module attributes {stable_mosaic.version = 11 : i64} {
  func.func @st_hier_kernel(%arg0: i32, %arg1: memref<32x512xbf16, #tpu.memory_space<vmem>>, %arg2: memref<16x512xf32, #tpu.memory_space<vmem>>, %arg3: memref<128x32xbf16, #tpu.memory_space<vmem>>, %arg4: memref<64x128xbf16, #tpu.memory_space<vmem>>, %arg5: memref<40x512xf32, #tpu.memory_space<vmem>>) attributes {dimension_semantics = [#tpu.dimension_semantics<parallel>], iteration_bounds = array<i64: 1>, scalar_prefetch = 0 : i64, scratch_operands = 0 : i64, tpu.core_type = #tpu.core_type<tc>, window_params = [{transform_indices = @transform_0, window_bounds = array<i64: 32, 512>}, {transform_indices = @transform_1, window_bounds = array<i64: 16, 512>}, {pipeline_mode = #tpu.pipeline_mode<synchronous>, transform_indices = @transform_2, window_bounds = array<i64: 128, 32>}, {pipeline_mode = #tpu.pipeline_mode<synchronous>, transform_indices = @transform_3, window_bounds = array<i64: 64, 128>}, {transform_indices = @transform_4, window_bounds = array<i64: 40, 512>}]} {
    %c0 = arith.constant 0 : index
    %c0_0 = arith.constant 0 : index
    %0 = vector.load %arg1[%c0, %c0_0] : memref<32x512xbf16, #tpu.memory_space<vmem>>, vector<32x512xbf16>
    %c0_1 = arith.constant 0 : index
    %c0_2 = arith.constant 0 : index
    %1 = vector.load %arg3[%c0_1, %c0_2] : memref<128x32xbf16, #tpu.memory_space<vmem>>, vector<128x32xbf16>
    %cst = arith.constant dense<0.000000e+00> : vector<128x512xf32>
    %2 = tpu.matmul %1, %0, %cst {dimension_numbers = #tpu.dot_dimension_numbers<[1], [0], [0], [1], [0, 0, 1, 1], [], []>} : vector<128x32xbf16>, vector<32x512xbf16>, vector<128x512xf32> -> vector<128x512xf32>
    %cst_3 = arith.constant 0.000000e+00 : f32
    %3 = vector.broadcast %cst_3 : f32 to vector<128x512xf32>
    %4 = arith.maximumf %2, %3 : vector<128x512xf32>
    %c0_4 = arith.constant 0 : index
    %c0_5 = arith.constant 0 : index
    %5 = vector.load %arg4[%c0_4, %c0_5] : memref<64x128xbf16, #tpu.memory_space<vmem>>, vector<64x128xbf16>
    %6 = arith.truncf %4 : vector<128x512xf32> to vector<128x512xbf16>
    %cst_6 = arith.constant dense<0.000000e+00> : vector<64x512xf32>
    %7 = tpu.matmul %5, %6, %cst_6 {dimension_numbers = #tpu.dot_dimension_numbers<[1], [0], [0], [1], [0, 0, 1, 1], [], []>} : vector<64x128xbf16>, vector<128x512xbf16>, vector<64x512xf32> -> vector<64x512xf32>
    %8 = vector.extract_strided_slice %7 {offsets = [0, 0], sizes = [16, 512], strides = [1, 1]} : vector<64x512xf32> to vector<16x512xf32>
    %9 = vector.extract_strided_slice %7 {offsets = [16, 0], sizes = [16, 512], strides = [1, 1]} : vector<64x512xf32> to vector<16x512xf32>
    %10 = vector.extract_strided_slice %7 {offsets = [32, 0], sizes = [16, 512], strides = [1, 1]} : vector<64x512xf32> to vector<16x512xf32>
    %11 = vector.extract_strided_slice %7 {offsets = [48, 0], sizes = [16, 512], strides = [1, 1]} : vector<64x512xf32> to vector<16x512xf32>
    %12 = arith.negf %11 : vector<16x512xf32>
    %13 = math.exp %12 : vector<16x512xf32>
    %cst_7 = arith.constant 1.000000e+00 : f32
    %14 = vector.broadcast %cst_7 : f32 to vector<16x512xf32>
    %15 = arith.addf %14, %13 : vector<16x512xf32>
    %16 = arith.divf %14, %15 : vector<16x512xf32>
    %17 = vector.extract_strided_slice %16 {offsets = [0, 0], sizes = [1, 512], strides = [1, 1]} : vector<16x512xf32> to vector<1x512xf32>
    %c0_8 = arith.constant 0 : index
    %c0_9 = arith.constant 0 : index
    %18 = vector.load %arg2[%c0_8, %c0_9] : memref<16x512xf32, #tpu.memory_space<vmem>>, vector<16x512xf32>
    %19 = arith.mulf %16, %18 : vector<16x512xf32>
    %cst_10 = arith.constant dense<0.000000e+00> : vector<512xf32>
    %20 = vector.multi_reduction <add>, %19, %cst_10 [0] : vector<16x512xf32> to vector<512xf32>
    %21 = vector.shape_cast %20 : vector<512xf32> to vector<1x512xf32>
    %22 = vector.broadcast %17 : vector<1x512xf32> to vector<16x512xf32>
    %23 = arith.mulf %8, %22 : vector<16x512xf32>
    %cst_11 = arith.constant 1.000000e+00 : f32
    %24 = vector.broadcast %cst_11 : f32 to vector<1x512xf32>
    %25 = arith.subf %24, %17 : vector<1x512xf32>
    %26 = vector.broadcast %21 : vector<1x512xf32> to vector<16x512xf32>
    %27 = arith.mulf %9, %26 : vector<16x512xf32>
    %cst_12 = arith.constant 1.000000e+00 : f32
    %28 = vector.broadcast %cst_12 : f32 to vector<1x512xf32>
    %29 = arith.subf %28, %21 : vector<1x512xf32>
    %30 = vector.broadcast %29 : vector<1x512xf32> to vector<16x512xf32>
    %31 = arith.mulf %10, %30 : vector<16x512xf32>
    %32 = arith.addf %27, %31 : vector<16x512xf32>
    %33 = vector.broadcast %25 : vector<1x512xf32> to vector<16x512xf32>
    %34 = arith.mulf %33, %32 : vector<16x512xf32>
    %35 = arith.addf %23, %34 : vector<16x512xf32>
    %36 = vector.shape_cast %21 : vector<1x512xf32> to vector<1x512xf32>
    %37 = vector.broadcast %36 : vector<1x512xf32> to vector<8x512xf32>
    %38 = tpu.concatenate %35, %8, %37 in 0 : vector<16x512xf32>, vector<16x512xf32>, vector<8x512xf32> -> vector<40x512xf32>
    %c0_13 = arith.constant 0 : index
    %c0_14 = arith.constant 0 : index
    %39 = vector.load %arg5[%c0_13, %c0_14] : memref<40x512xf32, #tpu.memory_space<vmem>>, vector<40x512xf32>
    tpu.vector_store %arg5[%c0_13, %c0_14], %38 {strides = array<i32>} : memref<40x512xf32, #tpu.memory_space<vmem>>, vector<40x512xf32>,
    return
  }
  func.func @transform_0(%arg0: i32) -> (i32, i32) {
    %c0_i32 = arith.constant 0 : i32
    %c0_i32_0 = arith.constant 0 : i32
    return %c0_i32, %arg0 : i32, i32
  }
  func.func @transform_1(%arg0: i32) -> (i32, i32) {
    %c0_i32 = arith.constant 0 : i32
    %c0_i32_0 = arith.constant 0 : i32
    return %c0_i32, %arg0 : i32, i32
  }
  func.func @transform_2(%arg0: i32) -> (i32, i32) {
    %c0_i32 = arith.constant 0 : i32
    %c0_i32_0 = arith.constant 0 : i32
    %c0_i32_1 = arith.constant 0 : i32
    return %c0_i32, %c0_i32_0 : i32, i32
  }
  func.func @transform_3(%arg0: i32) -> (i32, i32) {
    %c0_i32 = arith.constant 0 : i32
    %c0_i32_0 = arith.constant 0 : i32
    %c0_i32_1 = arith.constant 0 : i32
    return %c0_i32, %c0_i32_0 : i32, i32
  }
  func.func @transform_4(%arg0: i32) -> (i32, i32) {
    %c0_i32 = arith.constant 0 : i32
    %c0_i32_0 = arith.constant 0 : i32
    return %c0_i32, %arg0 : i32, i32
  }
}

</mosaic_0001>

<bundles_post_ra>
// kernel: _lambda_.1
= control target key start
LH: loop header
LB: loop body
LE: loop exit
PB: predicated region body
PF: predicated region fallthrough
CT: control target
= control target key end

     0   :  { %v952_v1 = vmov 0   ;;  %vm122_vm0 = vcmask 261120   ;;  %s1296_s0 = inlined_call_operand.vmem [shape: bf16[32,512], index: 0, kind: input, shape index: {}]   ;;  %s1297_s2 = inlined_call_operand.vmem [shape: bf16[128,32], index: 2, kind: input, shape index: {}]   ;;  %s1298_s3 = inlined_call_operand.vmem [shape: bf16[64,128], index: 3, kind: input, shape index: {}]   ;;  %s1299_s4 = inlined_call_operand.vmem [shape: f32[40,512], index: 4, kind: output, shape index: {}]   ;;  %s1300_s1 = inlined_call_operand.vmem [shape: f32[16,512], index: 1, kind: input, shape index: {}]  }
   0x1   :  { %v896_v0 = vld [vmem:[%s1296_s0 + $0x4] ss:$16 sps:$4 sm:$0xff]   ;;  %179 = vmatprep.mubr.bf16.mxu0 %v952_v1  ;;  %292 = vmatprep.mubr.bf16.mxu1 %v952_v1  ;;  %v898_v2 = vld [vmem:[%s1296_s0 + $0xc] ss:$16 sps:$4 sm:$0xff]   ;;  %v900_v3 = vld [vmem:[%s1296_s0] ss:$16 sps:$4 sm:$0xff]  }
   0x2   :  { %147 = vmatprep.subr.bf16.mxu0 %v896_v0  ;;  %v901_v4 = vld [vmem:[%s1296_s0 + $0x8] ss:$16 sps:$4 sm:$0xff]   ;;  %260 = vmatprep.subr.bf16.mxu1 %v898_v2  ;;  %v902_v5 = vld [vmem:[%s1296_s0 + $0x24] ss:$16 sps:$4 sm:$0xff]   ;;  %v904_v6 = vld [vmem:[%s1296_s0 + $0x2c] ss:$16 sps:$4 sm:$0xff]  }
   0x3   :  { %148 = vmatpush1.bf16.msra.mxu0 %v900_v3  ;;  %261 = vmatpush1.bf16.msra.mxu1 %v901_v4  ;;  %v906_v7 = vld [vmem:[%s1296_s0 + $0x20] ss:$16 sps:$4 sm:$0xff]   ;;  %v907_v8 = vld [vmem:[%s1296_s0 + $0x28] ss:$16 sps:$4 sm:$0xff]  }
   0x4   :  { %149 = vmatprep.subr.bf16.mxu0 %v902_v5  ;;  %262 = vmatprep.subr.bf16.mxu1 %v904_v6  ;;  %v908_v9 = vld [vmem:[%s1297_s2] sm:$0xff]   ;;  %v909_v10 = vld [vmem:[%s1297_s2 + $0x8] sm:$0xff]   ;;  %v910_v11 = vld [vmem:[%s1297_s2 + $0x10] sm:$0xff]  }
   0x5   :  { %v911_v12 = vld [vmem:[%s1297_s2 + $0x18] sm:$0xff]   ;;  %v912_v13 = vld [vmem:[%s1297_s2 + $0x20] sm:$0xff]   ;;  %v913_v14 = vld [vmem:[%s1297_s2 + $0x28] sm:$0xff]  }
   0x6   :  { %v914_v15 = vld [vmem:[%s1297_s2 + $0x30] sm:$0xff]   ;;  %v915_v16 = vld [vmem:[%s1297_s2 + $0x38] sm:$0xff]  }
   0x7   :  { %150 = vmatpush1.bf16.msra.mxu0 %v906_v7  ;;  %263 = vmatpush1.bf16.msra.mxu1 %v907_v8 }
   0xa   :  { %867 = vmatmul.mubr.msk.bf16.vlgmr.msra.gmra.mrb[0].mxu0 %vm122_vm0, %v908_v9  ;;  %875 = vmatmul.mubr.msk.bf16.vlgmr.msra.gmra.mrb[0].mxu1 %vm122_vm0, %v908_v9 }
   0xb   :  { %189 = vmatprep.mubr.bf16.mxu0 %v952_v1  ;;  %302 = vmatprep.mubr.bf16.mxu1 %v952_v1 }
  0x12   :  { %868 = vmatmul.mubr.msk.bf16.gmra.mrb[4].mxu0 %vm122_vm0, %v909_v10  ;;  %876 = vmatmul.mubr.msk.bf16.gmra.mrb[4].mxu1 %vm122_vm0, %v909_v10 }
  0x13   :  { %199 = vmatprep.mubr.bf16.mxu0 %v952_v1  ;;  %312 = vmatprep.mubr.bf16.mxu1 %v952_v1 }
  0x1a   :  { %869 = vmatmul.mubr.msk.bf16.gmra.mrb[8].mxu0 %vm122_vm0, %v910_v11  ;;  %877 = vmatmul.mubr.msk.bf16.gmra.mrb[8].mxu1 %vm122_vm0, %v910_v11 }
  0x1b   :  { %209 = vmatprep.mubr.bf16.mxu0 %v952_v1  ;;  %322 = vmatprep.mubr.bf16.mxu1 %v952_v1 }
  0x22   :  { %870 = vmatmul.mubr.msk.bf16.gmra.mrb[12].mxu0 %vm122_vm0, %v911_v12  ;;  %878 = vmatmul.mubr.msk.bf16.gmra.mrb[12].mxu1 %vm122_vm0, %v911_v12 }
  0x23   :  { %219 = vmatprep.mubr.bf16.mxu0 %v952_v1  ;;  %332 = vmatprep.mubr.bf16.mxu1 %v952_v1 }
  0x2a   :  { %871 = vmatmul.mubr.msk.bf16.gmra.mrb[16].mxu0 %vm122_vm0, %v912_v13  ;;  %879 = vmatmul.mubr.msk.bf16.gmra.mrb[16].mxu1 %vm122_vm0, %v912_v13 }
  0x2b   :  { %229 = vmatprep.mubr.bf16.mxu0 %v952_v1  ;;  %342 = vmatprep.mubr.bf16.mxu1 %v952_v1 }
  0x32   :  { %872 = vmatmul.mubr.msk.bf16.gmra.mrb[20].mxu0 %vm122_vm0, %v913_v14  ;;  %880 = vmatmul.mubr.msk.bf16.gmra.mrb[20].mxu1 %vm122_vm0, %v913_v14 }
  0x33   :  { %239 = vmatprep.mubr.bf16.mxu0 %v952_v1  ;;  %352 = vmatprep.mubr.bf16.mxu1 %v952_v1 }
  0x3a   :  { %873 = vmatmul.mubr.msk.bf16.gmra.mrb[24].mxu0 %vm122_vm0, %v914_v15  ;;  %881 = vmatmul.mubr.msk.bf16.gmra.mrb[24].mxu1 %vm122_vm0, %v914_v15 }
  0x3b   :  { %249 = vmatprep.mubr.bf16.mxu0 %v952_v1  ;;  %362 = vmatprep.mubr.bf16.mxu1 %v952_v1 }
  0x42   :  { %874 = vmatmul.mubr.msk.bf16.gmra.mrb[28].mxu0 %vm122_vm0, %v915_v16  ;;  %882 = vmatmul.mubr.msk.bf16.gmra.mrb[28].mxu1 %vm122_vm0, %v915_v16 }
  0x43   :  { %533 = vmatprep.mubr.bf16.mxu0 %v952_v1  ;;  %606 = vmatprep.mubr.bf16.mxu1 %v952_v1 }
  0xdd   :  { %v181_v17 = vpop.f32.mrb[0].mxu0  ;;  %v294_v18 = vpop.f32.mrb[0].mxu1 }
  0xde   :  { %v183_v19 = vpop.f32.mrb[1].mxu0  ;;  %v296_v20 = vpop.f32.mrb[1].mxu1  ;;  %v373_v23 = vmax.f32 %v181_v17, 0.0  ;;  %v375_v24 = vmax.f32 %v294_v18, 0.0 }
  0xdf   :  { %v185_v21 = vpop.f32.mrb[2].mxu0  ;;  %v298_v22 = vpop.f32.mrb[2].mxu1  ;;  %v374_v29 = vmax.f32 %v183_v19, 0.0  ;;  %v376_v30 = vmax.f32 %v296_v20, 0.0 }
  0xe0   :  { %v377_v25 = vmax.f32 %v185_v21, 0.0  ;;  %v379_v26 = vmax.f32 %v298_v22, 0.0  ;;  %v187_v27 = vpop.f32.mrb[3].mxu0  ;;  %v300_v28 = vpop.f32.mrb[3].mxu1 }
  0xe1   :  { %v378_v31 = vmax.f32 %v187_v27, 0.0  ;;  %v380_v32 = vmax.f32 %v300_v28, 0.0 }
  0xe2   :  { %v445_v33 = vpack.c.bf16 %v377_v25, %v373_v23  ;;  %v447_v34 = vpack.c.bf16 %v379_v26, %v375_v24 }
  0xe3   :  { %v446_v35 = vpack.c.bf16 %v378_v31, %v374_v29  ;;  %v448_v36 = vpack.c.bf16 %v380_v32, %v376_v30 }
  0xe5   :  { %v191_v37 = vpop.f32.mrb[4].mxu0  ;;  %v304_v38 = vpop.f32.mrb[4].mxu1  ;;  %501 = vmatprep.subr.bf16.mxu0 %v446_v35  ;;  %574 = vmatprep.subr.bf16.mxu1 %v448_v36 }
  0xe6   :  { %v193_v39 = vpop.f32.mrb[5].mxu0  ;;  %v306_v40 = vpop.f32.mrb[5].mxu1  ;;  %502 = vmatpush1.bf16.msra.mxu0 %v445_v33  ;;  %575 = vmatpush1.bf16.msra.mxu1 %v447_v34  ;;  %v381_v43 = vmax.f32 %v191_v37, 0.0  ;;  %v383_v44 = vmax.f32 %v304_v38, 0.0 }
  0xe7   :  { %v195_v41 = vpop.f32.mrb[6].mxu0  ;;  %v308_v42 = vpop.f32.mrb[6].mxu1  ;;  %v382_v49 = vmax.f32 %v193_v39, 0.0  ;;  %v384_v50 = vmax.f32 %v306_v40, 0.0 }
  0xe8   :  { %v385_v45 = vmax.f32 %v195_v41, 0.0  ;;  %v387_v46 = vmax.f32 %v308_v42, 0.0  ;;  %v197_v47 = vpop.f32.mrb[7].mxu0  ;;  %v310_v48 = vpop.f32.mrb[7].mxu1 }
  0xe9   :  { %v386_v51 = vmax.f32 %v197_v47, 0.0  ;;  %v388_v52 = vmax.f32 %v310_v48, 0.0 }
  0xea   :  { %v449_v53 = vpack.c.bf16 %v385_v45, %v381_v43  ;;  %v451_v54 = vpack.c.bf16 %v387_v46, %v383_v44 }
  0xeb   :  { %v450_v55 = vpack.c.bf16 %v386_v51, %v382_v49  ;;  %v452_v56 = vpack.c.bf16 %v388_v52, %v384_v50 }
  0xed   :  { %v201_v57 = vpop.f32.mrb[8].mxu0  ;;  %v314_v58 = vpop.f32.mrb[8].mxu1  ;;  %503 = vmatprep.subr.bf16.mxu0 %v450_v55  ;;  %576 = vmatprep.subr.bf16.mxu1 %v452_v56 }
  0xee   :  { %v203_v59 = vpop.f32.mrb[9].mxu0  ;;  %v316_v60 = vpop.f32.mrb[9].mxu1  ;;  %504 = vmatpush1.bf16.msra.mxu0 %v449_v53  ;;  %577 = vmatpush1.bf16.msra.mxu1 %v451_v54  ;;  %v389_v63 = vmax.f32 %v201_v57, 0.0  ;;  %v391_v0 = vmax.f32 %v314_v58, 0.0 }
  0xef   :  { %v205_v61 = vpop.f32.mrb[10].mxu0  ;;  %v318_v62 = vpop.f32.mrb[10].mxu1  ;;  %v390_v6 = vmax.f32 %v203_v59, 0.0  ;;  %v392_v7 = vmax.f32 %v316_v60, 0.0 }
  0xf0   :  { %v393_v2 = vmax.f32 %v205_v61, 0.0  ;;  %v395_v3 = vmax.f32 %v318_v62, 0.0  ;;  %v207_v4 = vpop.f32.mrb[11].mxu0  ;;  %v320_v5 = vpop.f32.mrb[11].mxu1 }
  0xf1   :  { %v394_v8 = vmax.f32 %v207_v4, 0.0  ;;  %v396_v9 = vmax.f32 %v320_v5, 0.0 }
  0xf2   :  { %v453_v10 = vpack.c.bf16 %v393_v2, %v389_v63  ;;  %v455_v11 = vpack.c.bf16 %v395_v3, %v391_v0 }
  0xf3   :  { %v454_v12 = vpack.c.bf16 %v394_v8, %v390_v6  ;;  %v456_v13 = vpack.c.bf16 %v396_v9, %v392_v7 }
  0xf5   :  { %v211_v14 = vpop.f32.mrb[12].mxu0  ;;  %v324_v15 = vpop.f32.mrb[12].mxu1  ;;  %505 = vmatprep.subr.bf16.mxu0 %v454_v12  ;;  %578 = vmatprep.subr.bf16.mxu1 %v456_v13 }
  0xf6   :  { %v213_v16 = vpop.f32.mrb[13].mxu0  ;;  %v326_v17 = vpop.f32.mrb[13].mxu1  ;;  %506 = vmatpush1.bf16.msra.mxu0 %v453_v10  ;;  %579 = vmatpush1.bf16.msra.mxu1 %v455_v11  ;;  %v397_v20 = vmax.f32 %v211_v14, 0.0  ;;  %v399_v21 = vmax.f32 %v324_v15, 0.0 }
  0xf7   :  { %v215_v18 = vpop.f32.mrb[14].mxu0  ;;  %v328_v19 = vpop.f32.mrb[14].mxu1  ;;  %v398_v26 = vmax.f32 %v213_v16, 0.0  ;;  %v400_v27 = vmax.f32 %v326_v17, 0.0 }
  0xf8   :  { %v401_v22 = vmax.f32 %v215_v18, 0.0  ;;  %v403_v23 = vmax.f32 %v328_v19, 0.0  ;;  %v217_v24 = vpop.f32.mrb[15].mxu0  ;;  %v330_v25 = vpop.f32.mrb[15].mxu1 }
  0xf9   :  { %v402_v28 = vmax.f32 %v217_v24, 0.0  ;;  %v404_v29 = vmax.f32 %v330_v25, 0.0 }
  0xfa   :  { %v457_v30 = vpack.c.bf16 %v401_v22, %v397_v20  ;;  %v459_v31 = vpack.c.bf16 %v403_v23, %v399_v21 }
  0xfb   :  { %v458_v32 = vpack.c.bf16 %v402_v28, %v398_v26  ;;  %v460_v33 = vpack.c.bf16 %v404_v29, %v400_v27 }
  0xfd   :  { %v221_v34 = vpop.f32.mrb[16].mxu0  ;;  %v334_v35 = vpop.f32.mrb[16].mxu1  ;;  %507 = vmatprep.subr.bf16.mxu0 %v458_v32  ;;  %580 = vmatprep.subr.bf16.mxu1 %v460_v33 }
  0xfe   :  { %v223_v36 = vpop.f32.mrb[17].mxu0  ;;  %v336_v37 = vpop.f32.mrb[17].mxu1  ;;  %508 = vmatpush1.bf16.msra.mxu0 %v457_v30  ;;  %581 = vmatpush1.bf16.msra.mxu1 %v459_v31  ;;  %v405_v40 = vmax.f32 %v221_v34, 0.0  ;;  %v407_v41 = vmax.f32 %v334_v35, 0.0 }
  0xff   :  { %v225_v38 = vpop.f32.mrb[18].mxu0  ;;  %v338_v39 = vpop.f32.mrb[18].mxu1  ;;  %v406_v46 = vmax.f32 %v223_v36, 0.0  ;;  %v408_v47 = vmax.f32 %v336_v37, 0.0 }
 0x100   :  { %v409_v42 = vmax.f32 %v225_v38, 0.0  ;;  %v411_v43 = vmax.f32 %v338_v39, 0.0  ;;  %v227_v44 = vpop.f32.mrb[19].mxu0  ;;  %v340_v45 = vpop.f32.mrb[19].mxu1 }
 0x101   :  { %v410_v48 = vmax.f32 %v227_v44, 0.0  ;;  %v412_v49 = vmax.f32 %v340_v45, 0.0 }
 0x102   :  { %v461_v50 = vpack.c.bf16 %v409_v42, %v405_v40  ;;  %v463_v51 = vpack.c.bf16 %v411_v43, %v407_v41 }
 0x103   :  { %v462_v52 = vpack.c.bf16 %v410_v48, %v406_v46  ;;  %v464_v53 = vpack.c.bf16 %v412_v49, %v408_v47 }
 0x105   :  { %v231_v54 = vpop.f32.mrb[20].mxu0  ;;  %v344_v55 = vpop.f32.mrb[20].mxu1  ;;  %509 = vmatprep.subr.bf16.mxu0 %v462_v52  ;;  %582 = vmatprep.subr.bf16.mxu1 %v464_v53  ;;  %v917_v52 = vld [vmem:[%s1298_s3 + $0x8] sm:$0xff]   ;;  %v918_v53 = vld [vmem:[%s1298_s3 + $0x10] sm:$0xff]  }
 0x106   :  { %v233_v56 = vpop.f32.mrb[21].mxu0  ;;  %v346_v57 = vpop.f32.mrb[21].mxu1  ;;  %510 = vmatpush1.bf16.msra.mxu0 %v461_v50  ;;  %583 = vmatpush1.bf16.msra.mxu1 %v463_v51  ;;  %v413_v60 = vmax.f32 %v231_v54, 0.0  ;;  %v415_v61 = vmax.f32 %v344_v55, 0.0  ;;  %v916_v51 = vld [vmem:[%s1298_s3] sm:$0xff]   ;;  %v919_v54 = vld [vmem:[%s1298_s3 + $0x18] sm:$0xff]  }
 0x107   :  { %v235_v58 = vpop.f32.mrb[22].mxu0  ;;  %v348_v59 = vpop.f32.mrb[22].mxu1  ;;  %v414_v3 = vmax.f32 %v233_v56, 0.0  ;;  %v416_v4 = vmax.f32 %v346_v57, 0.0 }
 0x108   :  { %v417_v62 = vmax.f32 %v235_v58, 0.0  ;;  %v419_v63 = vmax.f32 %v348_v59, 0.0  ;;  %v237_v0 = vpop.f32.mrb[23].mxu0  ;;  %v350_v2 = vpop.f32.mrb[23].mxu1 }
 0x109   :  { %v418_v5 = vmax.f32 %v237_v0, 0.0  ;;  %v420_v6 = vmax.f32 %v350_v2, 0.0 }
 0x10a   :  { %v465_v7 = vpack.c.bf16 %v417_v62, %v413_v60  ;;  %v467_v8 = vpack.c.bf16 %v419_v63, %v415_v61 }
 0x10b   :  { %v466_v9 = vpack.c.bf16 %v418_v5, %v414_v3  ;;  %v468_v10 = vpack.c.bf16 %v420_v6, %v416_v4 }
 0x10d   :  { %v241_v11 = vpop.f32.mrb[24].mxu0  ;;  %v354_v12 = vpop.f32.mrb[24].mxu1  ;;  %511 = vmatprep.subr.bf16.mxu0 %v466_v9  ;;  %584 = vmatprep.subr.bf16.mxu1 %v468_v10 }
 0x10e   :  { %v243_v13 = vpop.f32.mrb[25].mxu0  ;;  %v356_v14 = vpop.f32.mrb[25].mxu1  ;;  %512 = vmatpush1.bf16.msra.mxu0 %v465_v7  ;;  %585 = vmatpush1.bf16.msra.mxu1 %v467_v8  ;;  %v421_v17 = vmax.f32 %v241_v11, 0.0  ;;  %v423_v18 = vmax.f32 %v354_v12, 0.0 }
 0x10f   :  { %v245_v15 = vpop.f32.mrb[26].mxu0  ;;  %v358_v16 = vpop.f32.mrb[26].mxu1  ;;  %v422_v23 = vmax.f32 %v243_v13, 0.0  ;;  %v424_v24 = vmax.f32 %v356_v14, 0.0 }
 0x110   :  { %v425_v19 = vmax.f32 %v245_v15, 0.0  ;;  %v427_v20 = vmax.f32 %v358_v16, 0.0  ;;  %v247_v21 = vpop.f32.mrb[27].mxu0  ;;  %v360_v22 = vpop.f32.mrb[27].mxu1 }
 0x111   :  { %v426_v25 = vmax.f32 %v247_v21, 0.0  ;;  %v428_v26 = vmax.f32 %v360_v22, 0.0 }
 0x112   :  { %v469_v27 = vpack.c.bf16 %v425_v19, %v421_v17  ;;  %v471_v28 = vpack.c.bf16 %v427_v20, %v423_v18 }
 0x113   :  { %v470_v29 = vpack.c.bf16 %v426_v25, %v422_v23  ;;  %v472_v30 = vpack.c.bf16 %v428_v26, %v424_v24 }
 0x115   :  { %v251_v31 = vpop.f32.mrb[28].mxu0  ;;  %v364_v32 = vpop.f32.mrb[28].mxu1  ;;  %513 = vmatprep.subr.bf16.mxu0 %v470_v29  ;;  %586 = vmatprep.subr.bf16.mxu1 %v472_v30 }
 0x116   :  { %v253_v33 = vpop.f32.mrb[29].mxu0  ;;  %v366_v34 = vpop.f32.mrb[29].mxu1  ;;  %514 = vmatpush1.bf16.msra.mxu0 %v469_v27  ;;  %587 = vmatpush1.bf16.msra.mxu1 %v471_v28  ;;  %v429_v37 = vmax.f32 %v251_v31, 0.0  ;;  %v431_v38 = vmax.f32 %v364_v32, 0.0 }
 0x117   :  { %v255_v35 = vpop.f32.mrb[30].mxu0  ;;  %v368_v36 = vpop.f32.mrb[30].mxu1  ;;  %v430_v43 = vmax.f32 %v253_v33, 0.0  ;;  %v432_v44 = vmax.f32 %v366_v34, 0.0 }
 0x118   :  { %v433_v39 = vmax.f32 %v255_v35, 0.0  ;;  %v435_v40 = vmax.f32 %v368_v36, 0.0  ;;  %v257_v41 = vpop.f32.mrb[31].mxu0  ;;  %v370_v42 = vpop.f32.mrb[31].mxu1  ;;  %v739_v35 = vlaneseq }
 0x119   :  { %v434_v45 = vmax.f32 %v257_v41, 0.0  ;;  %v436_v46 = vmax.f32 %v370_v42, 0.0 }
 0x11a   :  { %v473_v47 = vpack.c.bf16 %v433_v39, %v429_v37  ;;  %v475_v48 = vpack.c.bf16 %v435_v40, %v431_v38 }
 0x11b   :  { %v474_v49 = vpack.c.bf16 %v434_v45, %v430_v43  ;;  %v476_v50 = vpack.c.bf16 %v436_v46, %v432_v44  ;;  %v740_v44 = vshrl.u32 %v739_v35, 7 }
 0x11d   :  { %515 = vmatprep.subr.bf16.mxu0 %v474_v49  ;;  %588 = vmatprep.subr.bf16.mxu1 %v476_v50  ;;  %v1158_v49 = vsub.s32 0, %v740_v44 }
 0x11e   :  { %516 = vmatpush1.bf16.msra.mxu0 %v473_v47  ;;  %589 = vmatpush1.bf16.msra.mxu1 %v475_v48 }
 0x121   :  { %534 = vmatmul.mubr.bf16.vlgmr.msra.gmra.mrb[32].mxu0 %v916_v51  ;;  %607 = vmatmul.mubr.bf16.vlgmr.msra.gmra.mrb[32].mxu1 %v916_v51 }
 0x122   :  { %543 = vmatprep.mubr.bf16.mxu0 %v952_v1  ;;  %616 = vmatprep.mubr.bf16.mxu1 %v952_v1 }
 0x129   :  { %544 = vmatmul.mubr.bf16.gmra.mrb[36].mxu0 %v917_v52  ;;  %617 = vmatmul.mubr.bf16.gmra.mrb[36].mxu1 %v917_v52 }
 0x12a   :  { %553 = vmatprep.mubr.bf16.mxu0 %v952_v1  ;;  %626 = vmatprep.mubr.bf16.mxu1 %v952_v1 }
 0x131   :  { %554 = vmatmul.mubr.bf16.gmra.mrb[40].mxu0 %v918_v53  ;;  %627 = vmatmul.mubr.bf16.gmra.mrb[40].mxu1 %v918_v53 }
 0x132   :  { %563 = vmatprep.mubr.bf16.mxu0 %v952_v1  ;;  %636 = vmatprep.mubr.bf16.mxu1 %v952_v1 }
 0x139   :  { %564 = vmatmul.mubr.bf16.gmra.mrb[44].mxu0 %v919_v54  ;;  %637 = vmatmul.mubr.bf16.gmra.mrb[44].mxu1 %v919_v54 }
 0x1f4   :  { %v1078_v55 = vpop.f32.mrb[32].mxu0  ;;  %v1080_v56 = vpop.f32.mrb[32].mxu1 }
 0x1f5   :  { %835 = vst [vmem:[%s1299_s4 + $0x40] sm:$0xff] %v1078_v55  ;;  %837 = vst [vmem:[%s1299_s4 + $0x50] sm:$0xff] %v1080_v56  ;;  %v1090_v1 = vpop.f32.mrb[33].mxu0  ;;  %v1092_v57 = vpop.f32.mrb[33].mxu1 }
 0x1f6   :  { %836 = vst [vmem:[%s1299_s4 + $0x48] sm:$0xff] %v1090_v1  ;;  %838 = vst [vmem:[%s1299_s4 + $0x58] sm:$0xff] %v1092_v57  ;;  %v1102_v58 = vpop.f32.mrb[34].mxu0  ;;  %v1104_v59 = vpop.f32.mrb[34].mxu1 }
 0x1f7   :  { %839 = vst [vmem:[%s1299_s4 + $0x60] sm:$0xff] %v1102_v58  ;;  %841 = vst [vmem:[%s1299_s4 + $0x70] sm:$0xff] %v1104_v59  ;;  %v1114_v60 = vpop.f32.mrb[35].mxu0  ;;  %v1116_v61 = vpop.f32.mrb[35].mxu1 }
 0x1f8   :  { %840 = vst [vmem:[%s1299_s4 + $0x68] sm:$0xff] %v1114_v60  ;;  %842 = vst [vmem:[%s1299_s4 + $0x78] sm:$0xff] %v1116_v61 }
 0x1fc   :  { %v1126_v62 = vpop.f32.mrb[36].mxu0  ;;  %v1128_v63 = vpop.f32.mrb[36].mxu1 }
 0x1fd   :  { %v1130_v0 = vpop.f32.mrb[37].mxu0  ;;  %v1132_v2 = vpop.f32.mrb[37].mxu1 }
 0x1fe   :  { %v1134_v3 = vpop.f32.mrb[38].mxu0  ;;  %v1136_v4 = vpop.f32.mrb[38].mxu1 }
 0x1ff   :  { %v1138_v5 = vpop.f32.mrb[39].mxu0  ;;  %v1140_v6 = vpop.f32.mrb[39].mxu1 }
 0x204   :  { %v1142_v7 = vpop.f32.mrb[40].mxu0  ;;  %v1144_v8 = vpop.f32.mrb[40].mxu1 }
 0x205   :  { %v1146_v9 = vpop.f32.mrb[41].mxu0  ;;  %v1148_v10 = vpop.f32.mrb[41].mxu1 }
 0x206   :  { %v1150_v11 = vpop.f32.mrb[42].mxu0  ;;  %v1152_v12 = vpop.f32.mrb[42].mxu1 }
 0x207   :  { %v1154_v13 = vpop.f32.mrb[43].mxu0  ;;  %v1156_v14 = vpop.f32.mrb[43].mxu1 }
 0x20c   :  { %v565_v15 = vpop.f32.mrb[44].mxu0  ;;  %v638_v16 = vpop.f32.mrb[44].mxu1 }
 0x20d   :  { %v887_v17 = vmul.f32 -1.442695, %v565_v15  ;;  %v889_v18 = vmul.f32 -1.442695, %v638_v16  ;;  %v567_v19 = vpop.f32.mrb[45].mxu0  ;;  %v640_v20 = vpop.f32.mrb[45].mxu1 }
 0x20e   :  { %v888_v21 = vmul.f32 -1.442695, %v567_v19  ;;  %v890_v22 = vmul.f32 -1.442695, %v640_v20  ;;  %v569_v23 = vpop.f32.mrb[46].mxu0  ;;  %v642_v24 = vpop.f32.mrb[46].mxu1 }
 0x20f   :  { %920 = vpow2.f32 %v887_v17  ;;  %v891_v25 = vmul.f32 -1.442695, %v569_v23  ;;  %v571_v26 = vpop.f32.mrb[47].mxu0  ;;  %v644_v27 = vpop.f32.mrb[47].mxu1  ;;  %v893_v28 = vmul.f32 -1.442695, %v642_v24 }
 0x210   :  { %922 = vpow2.f32 %v889_v18  ;;  %v892_v29 = vmul.f32 -1.442695, %v571_v26  ;;  %v894_v30 = vmul.f32 -1.442695, %v644_v27  ;;  %v695_v15 = vld [vmem:[%s1300_s1] sm:$0xff]  ;;  %v696_v24 = vld [vmem:[%s1300_s1 + $0x8] sm:$0xff] }
 0x211   :  { %924 = vpow2.f32 %v888_v21  ;;  %v699_v20 = vld [vmem:[%s1300_s1 + $0x20] sm:$0xff]  ;;  %v697_v21 = vld [vmem:[%s1300_s1 + $0x10] sm:$0xff] }
 0x212   :  { %926 = vpow2.f32 %v890_v22  ;;  %v701_v22 = vld [vmem:[%s1300_s1 + $0x30] sm:$0xff] }
 0x213   :  { %928 = vpow2.f32 %v891_v25  ;;  %v700_v25 = vld [vmem:[%s1300_s1 + $0x28] sm:$0xff] }
 0x214   :  { %930 = vpow2.f32 %v893_v28 }
 0x215   :  { %932 = vpow2.f32 %v892_v29  ;;  %v702_v29 = vld [vmem:[%s1300_s1 + $0x38] sm:$0xff] }
 0x216   :  { %934 = vpow2.f32 %v894_v30 }
 0x219   :  { %v921_v31 = vpop.eup %920 }
 0x21a   :  { %v923_v32 = vpop.eup %922  ;;  %v671_v33 = vadd.f32 1.0, %v921_v31 }
 0x21b   :  { %v925_v34 = vpop.eup %924  ;;  %v673_v36 = vadd.f32 1.0, %v923_v32 }
 0x21c   :  { %v927_v37 = vpop.eup %926  ;;  %936 = vrcp.f32 %v671_v33  ;;  %v672_v38 = vadd.f32 1.0, %v925_v34 }
 0x21d   :  { %v929_v39 = vpop.eup %928  ;;  %938 = vrcp.f32 %v673_v36  ;;  %v674_v40 = vadd.f32 1.0, %v927_v37 }
 0x21e   :  { %v931_v41 = vpop.eup %930  ;;  %940 = vrcp.f32 %v672_v38  ;;  %v675_v42 = vadd.f32 1.0, %v929_v39 }
 0x21f   :  { %v933_v43 = vpop.eup %932  ;;  %942 = vrcp.f32 %v674_v40  ;;  %v677_v45 = vadd.f32 1.0, %v931_v41 }
 0x220   :  { %v935_v46 = vpop.eup %934  ;;  %944 = vrcp.f32 %v675_v42  ;;  %v676_v47 = vadd.f32 1.0, %v933_v43 }
 0x221   :  { %946 = vrcp.f32 %v677_v45  ;;  %v678_v48 = vadd.f32 1.0, %v935_v46 }
 0x222   :  { %948 = vrcp.f32 %v676_v47 }
 0x223   :  { %950 = vrcp.f32 %v678_v48 }
 0x226   :  { %v1160_v50 = vpop.eup %936 }
 0x227   :  { %v1162_v51 = vpop.eup %938  ;;  %v742_v52 = vrot.slane %v1160_v50, %v1158_v49  ;;  %v703_v31 = vmul.f32 %v1160_v50, %v695_v15 }
 0x228   :  { %v1166_v53 = vpop.eup %940  ;;  %v750_v54 = vrot.slane %v1162_v51, %v1158_v49 }
 0x229   :  { %v1173_v16 = vpop.eup %942  ;;  %v1176_v17 = vmul.f32 %v742_v52, %v1078_v55  ;;  %v1179_v18 = vmul.f32 %v742_v52, %v1102_v58  ;;  %v746_v19 = vrot.slane %v1166_v53, %v1158_v49  ;;  %v704_v36 = vmul.f32 %v1166_v53, %v696_v24 }
 0x22a   :  { %v945_v55 = vpop.eup %944  ;;  %v1193_v23 = vmul.f32 %v750_v54, %v1080_v56  ;;  %v1196_v58 = vmul.f32 %v750_v54, %v1104_v59  ;;  %v754_v56 = vrot.slane %v1173_v16, %v1158_v49  ;;  %v698_v59 = vld [vmem:[%s1300_s1 + $0x18] sm:$0xff] }
 0x22b   :  { %v947_v26 = vpop.eup %946  ;;  %v1205_v27 = vmul.f32 %v746_v19, %v1090_v1  ;;  %v1208_v28 = vmul.f32 %v746_v19, %v1114_v60  ;;  %v707_v32 = vmul.f32 %v945_v55, %v699_v20  ;;  %v705_v1 = vmul.f32 %v1162_v51, %v697_v21 }
 0x22c   :  { %v949_v30 = vpop.eup %948  ;;  %v709_v33 = vmul.f32 %v947_v26, %v701_v22  ;;  %v1221_v34 = vmul.f32 %v754_v56, %v1092_v57  ;;  %v1224_v35 = vmul.f32 %v754_v56, %v1116_v61  ;;  %v706_v40 = vmul.f32 %v1173_v16, %v698_v59 }
 0x22d   :  { %v951_v60 = vpop.eup %950  ;;  %v708_v37 = vmul.f32 %v949_v30, %v700_v25  ;;  %v711_v38 = vadd.f32 %v707_v32, %v703_v31  ;;  %v763_v55 = vsub.f32 1.0, %v1160_v50 }
 0x22e   :  { %v725_v39 = vadd.f32 %v709_v33, %v705_v1  ;;  %v710_v41 = vmul.f32 %v951_v60, %v702_v29  ;;  %v765_v1 = vsub.f32 1.0, %v1162_v51  ;;  %v764_v33 = vsub.f32 1.0, %v1166_v53 }
 0x22f   :  { %v718_v42 = vadd.f32 %v708_v37, %v704_v36  ;;  %v712_v43 = vrot.slane %v711_v38, 4  ;;  %v798_v32 = vrot.slane %v763_v55, %v1158_v49 }
 0x230   :  { %v726_v44 = vrot.slane %v725_v39, 4  ;;  %v732_v45 = vadd.f32 %v710_v41, %v706_v40 }
 0x231   :  { %v719_v46 = vrot.slane %v718_v42, 4  ;;  %v713_v47 = vadd.f32 %v712_v43, %v711_v38  ;;  %v802_v43 = vrot.slane %v764_v33, %v1158_v49 }
 0x232   :  { %v727_v48 = vadd.f32 %v726_v44, %v725_v39  ;;  %v733_v57 = vrot.slane %v732_v45, 4 }
 0x233   :  { %v720_v52 = vadd.f32 %v719_v46, %v718_v42  ;;  %v714_v54 = vrot.slane %v713_v47, 2  ;;  %v806_v42 = vrot.slane %v765_v1, %v1158_v49 }
 0x234   :  { %v728_v61 = vrot.slane %v727_v48, 2  ;;  %v734_v15 = vadd.f32 %v733_v57, %v732_v45 }
 0x235   :  { %v721_v19 = vrot.slane %v720_v52, 2  ;;  %v715_v20 = vadd.f32 %v714_v54, %v713_v47  ;;  %v766_v54 = vsub.f32 1.0, %v1173_v16 }
 0x236   :  { %v729_v21 = vadd.f32 %v728_v61, %v727_v48  ;;  %v735_v22 = vrot.slane %v734_v15, 2 }
 0x237   :  { %v722_v24 = vadd.f32 %v721_v19, %v720_v52  ;;  %v716_v25 = vrot.slane %v715_v20, 1 }
 0x238   :  { %v730_v26 = vrot.slane %v729_v21, 1  ;;  %v736_v56 = vadd.f32 %v735_v22, %v734_v15 }
 0x239   :  { %v723_v59 = vrot.slane %v722_v24, 1  ;;  %v717_v29 = vadd.f32 %v716_v25, %v715_v20 }
 0x23a   :  { %v731_v30 = vadd.f32 %v730_v26, %v729_v21  ;;  %v737_v31 = vrot.slane %v736_v56, 1 }
 0x23b   :  { %v724_v60 = vadd.f32 %v723_v59, %v722_v24  ;;  %v767_v36 = vmul.f32 %v717_v29, %v1126_v62  ;;  %v771_v37 = vmul.f32 %v717_v29, %v1134_v3  ;;  %v775_v50 = vsub.f32 1.0, %v717_v29  ;;  %843 = vst [vmem:[%s1299_s4 + $0x80] sm:$0xff] %v717_v29 }
 0x23c   :  { %v769_v38 = vmul.f32 %v731_v30, %v1128_v63  ;;  %845 = vst [vmem:[%s1299_s4 + $0x90] sm:$0xff] %v731_v30  ;;  %v773_v51 = vmul.f32 %v731_v30, %v1136_v4  ;;  %v777_v39 = vsub.f32 1.0, %v731_v30  ;;  %v738_v41 = vadd.f32 %v737_v31, %v736_v56 }
 0x23d   :  { %v768_v53 = vmul.f32 %v724_v60, %v1130_v0  ;;  %v772_v62 = vmul.f32 %v724_v60, %v1138_v5  ;;  %844 = vst [vmem:[%s1299_s4 + $0x88] sm:$0xff] %v724_v60  ;;  %v779_v3 = vmul.f32 %v775_v50, %v1142_v7  ;;  %v783_v40 = vmul.f32 %v775_v50, %v1150_v11 }
 0x23e   :  { %v776_v63 = vsub.f32 1.0, %v724_v60  ;;  %v781_v4 = vmul.f32 %v777_v39, %v1144_v8  ;;  %v785_v0 = vmul.f32 %v777_v39, %v1152_v12  ;;  %846 = vst [vmem:[%s1299_s4 + $0x98] sm:$0xff] %v738_v41  ;;  %v770_v47 = vmul.f32 %v738_v41, %v1132_v2 }
 0x23f   :  { %v787_v44 = vadd.f32 %v779_v3, %v767_v36  ;;  %v791_v5 = vadd.f32 %v783_v40, %v771_v37  ;;  %v774_v48 = vmul.f32 %v738_v41, %v1140_v6  ;;  %v778_v15 = vsub.f32 1.0, %v738_v41 }
 0x240   :  { %v780_v45 = vmul.f32 %v776_v63, %v1146_v9  ;;  %v784_v46 = vmul.f32 %v776_v63, %v1154_v13  ;;  %v789_v7 = vadd.f32 %v781_v4, %v769_v38  ;;  %v793_v11 = vadd.f32 %v785_v0, %v773_v51 }
 0x241   :  { %v811_v57 = vmul.f32 %v798_v32, %v787_v44  ;;  %v815_v8 = vmul.f32 %v798_v32, %v791_v5  ;;  %v782_v6 = vmul.f32 %v778_v15, %v1148_v10  ;;  %v786_v55 = vmul.f32 %v778_v15, %v1156_v14 }
 0x242   :  { %v788_v52 = vadd.f32 %v780_v45, %v768_v53  ;;  %v792_v12 = vadd.f32 %v784_v46, %v772_v62  ;;  %v813_v61 = vmul.f32 %v806_v42, %v789_v7  ;;  %v817_v9 = vmul.f32 %v806_v42, %v793_v11 }
 0x243   :  { %v819_v13 = vadd.f32 %v811_v57, %v1176_v17  ;;  %v823_v19 = vadd.f32 %v815_v8, %v1179_v18  ;;  %v810_v18 = vrot.slane %v766_v54, %v1158_v49  ;;  %v790_v10 = vadd.f32 %v782_v6, %v770_v47 }
 0x244   :  { %v812_v20 = vmul.f32 %v802_v43, %v788_v52  ;;  %v816_v21 = vmul.f32 %v802_v43, %v792_v12  ;;  %v821_v22 = vadd.f32 %v813_v61, %v1193_v23  ;;  %v825_v2 = vadd.f32 %v817_v9, %v1196_v58 }
 0x245   :  { %827 = vst [vmem:[%s1299_s4] sm:$0xff] %v819_v13  ;;  %831 = vst [vmem:[%s1299_s4 + $0x20] sm:$0xff] %v823_v19  ;;  %v794_v14 = vadd.f32 %v786_v55, %v774_v48  ;;  %v814_v23 = vmul.f32 %v810_v18, %v790_v10 }
 0x246   :  { %v820_v16 = vadd.f32 %v812_v20, %v1205_v27  ;;  %v824_v17 = vadd.f32 %v816_v21, %v1208_v28  ;;  %829 = vst [vmem:[%s1299_s4 + $0x10] sm:$0xff] %v821_v22  ;;  %833 = vst [vmem:[%s1299_s4 + $0x30] sm:$0xff] %v825_v2 }
 0x247   :  { %v818_v49 = vmul.f32 %v810_v18, %v794_v14  ;;  %v822_v58 = vadd.f32 %v814_v23, %v1221_v34 }
 0x248   :  { %828 = vst [vmem:[%s1299_s4 + $0x8] sm:$0xff] %v820_v16  ;;  %832 = vst [vmem:[%s1299_s4 + $0x28] sm:$0xff] %v824_v17 }
 0x249   :  { %v826_v27 = vadd.f32 %v818_v49, %v1224_v35  ;;  %830 = vst [vmem:[%s1299_s4 + $0x18] sm:$0xff] %v822_v58 }
 0x24b   :  { %834 = vst [vmem:[%s1299_s4 + $0x38] sm:$0xff] %v826_v27 }

</bundles_post_ra>
